<compile_context>
chip_gen: v6e
topology: v6e:2x2x1
jax: 0.10.0
libtpu: 0.0.40
codegen_flags: <defaults>
</compile_context>

<pallas_src>
import numpy as np
import jax
import jax.numpy as jnp
from jax.experimental import pallas as pl
from jax.experimental.pallas import tpu as pltpu  # noqa: F401  (TPU-specific tuning hooks)
from jax.scipy.special import erf as _jax_erf     # reference path only (outside the kernel)

_INV_SQRT2 = 0.7071067811865476


# --------------------------------------------------------------------------------------
# One-time host-side graph construction (mirrors the module's _edge_cache).
# --------------------------------------------------------------------------------------
def _build_normalized_adjacency_T(H, W):
    """Dense transpose of D^-1/2 (A+I) D^-1/2, replicating build_graph + gcn_norm.

    Returned pre-transposed (A^T, numpy float32) so the in-kernel aggregation is the
    lane-contiguous contraction  h_cn @ A^T  — one host-side transpose, never per call.
    """
    N = H * W
    ii, jj = np.meshgrid(np.arange(H), np.arange(W), indexing="ij")
    nodes = np.stack([ii.ravel(), jj.ravel()], axis=1).astype(np.float32)   # (N, 2)
    d2 = ((nodes[:, None, :] - nodes[None, :, :]) ** 2).sum(-1)             # squared cdist
    # NOTE: torch.topk breaks distance ties differently from stable argsort; interior grid
    # nodes have >4 equidistant candidates, so the exact edge set can differ from the
    # PyTorch module on those ties (degree/normalization structure is identical).
    nbr = np.argsort(d2, axis=1, kind="stable")[:, :4]                      # topk(k=4, largest=False)
    src = np.repeat(np.arange(N), 4)                                        # source_nodes
    tgt = nbr.reshape(-1)                                                   # target_nodes
    # gcn_norm / add_remaining_self_loops: drop existing self loops, add one per node (w=1)
    mask = src != tgt
    src = np.concatenate([src[mask], np.arange(N)])
    tgt = np.concatenate([tgt[mask], np.arange(N)])
    w = np.ones_like(src, dtype=np.float32)
    deg = np.zeros(N, dtype=np.float32)
    np.add.at(deg, tgt, w)                                                  # in-degree at target
    dis = np.where(deg > 0, deg ** -0.5, 0.0).astype(np.float32)
    norm = dis[src] * w * dis[tgt]
    a_t = np.zeros((N, N), dtype=np.float32)
    np.add.at(a_t, (src, tgt), norm)    # A[tgt, src] += norm  =>  builds A^T directly
    return a_t


# --------------------------------------------------------------------------------------
# One-time parameter prep (hoisted out of the per-call path, per perf review).
# --------------------------------------------------------------------------------------
def prepare_gcn_params(w1, b1, w2, b2, batch):
    """Build block-diagonal kron(I_B, W) channel-mix weights (bf16, MXU-native) and
    per-row bias columns (f32).  Depends only on the static weights and B — call once,
    reuse across forward passes."""
    C = w1.shape[0]
    eye_b = jnp.eye(batch, dtype=jnp.float32)
    w1_bd = jnp.kron(eye_b, w1.astype(jnp.float32)).astype(jnp.bfloat16)    # (B*C, B*C)
    w2_bd = jnp.kron(eye_b, w2.astype(jnp.float32)).astype(jnp.bfloat16)
    b1_col = jnp.tile(b1.astype(jnp.float32), batch).reshape(batch * C, 1)  # (B*C, 1)
    b2_col = jnp.tile(b2.astype(jnp.float32), batch).reshape(batch * C, 1)
    return w1_bd, b1_col, w2_bd, b2_col


# --------------------------------------------------------------------------------------
# Kernel
# --------------------------------------------------------------------------------------
def _erf_poly(z):
    """Abramowitz & Stegun 7.1.26 erf approximation (max abs error 1.5e-7).
    Uses only exp/mul/add/div/where — all with guaranteed Mosaic lowerings."""
    s = jnp.where(z >= 0.0, 1.0, -1.0)
    z = jnp.abs(z)
    t = 1.0 / (1.0 + 0.3275911 * z)
    poly = t * (0.254829592 + t * (-0.284496736 + t * (1.421413741
                + t * (-1.453152027 + t * 1.061405429))))
    return s * (1.0 - poly * jnp.exp(-z * z))


def _gelu_exact(h):
    # exact (erf-based) GELU, matching torch.nn.GELU() default
    return 0.5 * h * (1.0 + _erf_poly(h * _INV_SQRT2))


def _gcn_block_kernel(x_ref, at_ref, w1_ref, b1_ref, w2_ref, b2_ref, o_ref):
    # x: (B*C, N) channel-major, N = H*W = 256 lane-dense; a_t: (N, N) bf16 adjacency^T.
    x = x_ref[...].astype(jnp.bfloat16)
    a_t = at_ref[...]

    # GCNConv 1: channel mix (block-diagonal shared weight) then neighbourhood aggregation.
    # bf16 MXU operands, f32 accumulation.
    h = jnp.dot(w1_ref[...], x, preferred_element_type=jnp.float32)
    h = jnp.dot(h.astype(jnp.bfloat16), a_t, preferred_element_type=jnp.float32)
    h = h + b1_ref[...]

    h = _gelu_exact(h)                                    # f32 activation math

    # GCNConv 2
    h = jnp.dot(w2_ref[...], h.astype(jnp.bfloat16), preferred_element_type=jnp.float32)
    h = jnp.dot(h.astype(jnp.bfloat16), a_t, preferred_element_type=jnp.float32)
    h = h + b2_ref[...]

    o_ref[...] = h.astype(o_ref.dtype)


# --------------------------------------------------------------------------------------
# Wrapper (per-call path: free reshape views + one pallas_call)
# --------------------------------------------------------------------------------------
@jax.jit
def graph_conv_block(x, a_t, params):
    """x: [B, C, H, W] float32 (NCHW, like the PyTorch module).
    a_t: (N, N) bf16 transposed normalized adjacency.
    params: output of prepare_gcn_params (built once, reused every call)."""
    B, C, H, W = x.shape
    N = H * W
    BC = B * C
    w1_bd, b1_col, w2_bd, b2_col = params

    x_flat = x.reshape(BC, N)   # free view of contiguous NCHW; N on the lane axis

    # Single grid step: whole batch stacked on sublanes, everything resident in VMEM.
    # A^T is 128 KiB (bf16) at N=256 — far below any scoped-VMEM limit on v5e/v6e/v7x.
    # If H*W ever grows (N >~ 3K), K-tile A^T columns with a BlockSpec + VMEM accumulator
    # (or keep A^T in pl.ANY with a manual double-buffered copy) to stay inside v7x's
    # 64 MiB VMEM; not needed at this size.
    out_flat = pl.pallas_call(
        _gcn_block_kernel,
        out_shape=jax.ShapeDtypeStruct((BC, N), x.dtype),
    )(x_flat, a_t, w1_bd, b1_col, w2_bd, b2_col)

    return out_flat.reshape(B, C, H, W)   # free view back to NCHW


# --------------------------------------------------------------------------------------
# Pure-f32 JAX reference (same adjacency, exact erf GELU)
# --------------------------------------------------------------------------------------
def _reference(x, a_t_f32, w1, b1, w2, b2):
    B, C, H, W = x.shape
    A = a_t_f32.T                                              # node-major adjacency
    xn = x.reshape(B, C, -1).transpose(0, 2, 1)                # (B, N, C)
    h = jnp.einsum("nm,bmc->bnc", A, xn @ w1.T) + b1
    h = 0.5 * h * (1.0 + _jax_erf(h * _INV_SQRT2))
    h = jnp.einsum("nm,bmc->bnc", A, h @ w2.T) + b2
    return h.transpose(0, 2, 1).reshape(B, C, H, W)


if __name__ == "__main__":
    B, C, H, W = 2, 4, 16, 16

    key = jax.random.PRNGKey(0)
    kx, k1, k2, k3, k4 = jax.random.split(key, 5)

    x = jax.random.normal(kx, (B, C, H, W), dtype=jnp.float32)

    # Deterministic parameter init (glorot-like scale); GCNConv lin weight is [out, in].
    scale = float(np.sqrt(6.0 / (C + C)))
    w1 = jax.random.uniform(k1, (C, C), jnp.float32, -scale, scale)
    w2 = jax.random.uniform(k2, (C, C), jnp.float32, -scale, scale)
    b1 = 0.01 * jax.random.normal(k3, (C,), dtype=jnp.float32)
    b2 = 0.01 * jax.random.normal(k4, (C,), dtype=jnp.float32)

    # --- one-time setup (hoisted out of the per-call path) ---
    a_t_np = _build_normalized_adjacency_T(H, W)               # (N, N) = A^T, f32 numpy
    a_t = jnp.asarray(a_t_np, dtype=jnp.bfloat16)              # kernel operand (half-size DMA)
    a_t_f32 = jnp.asarray(a_t_np)                              # f32 copy for the reference only
    params = prepare_gcn_params(w1, b1, w2, b2, B)             # kron/tile done once, not per call

    out = graph_conv_block(x, a_t, params)
    out = jax.block_until_ready(out)

    ref = jax.block_until_ready(_reference(x, a_t_f32, w1, b1, w2, b2))
    assert out.shape == (B, C, H, W)
    # bf16 MXU operands (A^T, x, h, W) with f32 accumulation vs a pure-f32 reference:
    # expected ~1e-2 relative error after two chained GCN layers, hence bf16-level tolerance.
    np.testing.assert_allclose(np.asarray(out), np.asarray(ref), rtol=2e-2, atol=2e-2)

    print("KERNEL_OK")
</pallas_src>

<mosaic_0001>
module attributes {stable_mosaic.version = 11 : i64} {
  func.func @_gcn_block_kernel(%arg0: memref<8x256xf32, #tpu.memory_space<vmem>>, %arg1: memref<256x256xbf16, #tpu.memory_space<vmem>>, %arg2: memref<8x8xbf16, #tpu.memory_space<vmem>>, %arg3: memref<8x1xf32, #tpu.memory_space<vmem>>, %arg4: memref<8x8xbf16, #tpu.memory_space<vmem>>, %arg5: memref<8x1xf32, #tpu.memory_space<vmem>>, %arg6: memref<8x256xf32, #tpu.memory_space<vmem>>) attributes {dimension_semantics = [], scalar_prefetch = 0 : i64, scratch_operands = 0 : i64, tpu.core_type = #tpu.core_type<tc>} {
    %c0 = arith.constant 0 : index
    %c0_0 = arith.constant 0 : index
    %0 = vector.load %arg0[%c0, %c0_0] : memref<8x256xf32, #tpu.memory_space<vmem>>, vector<8x256xf32>
    %1 = arith.truncf %0 : vector<8x256xf32> to vector<8x256xbf16>
    %c0_1 = arith.constant 0 : index
    %c0_2 = arith.constant 0 : index
    %2 = vector.load %arg1[%c0_1, %c0_2] : memref<256x256xbf16, #tpu.memory_space<vmem>>, vector<256x256xbf16>
    %c0_3 = arith.constant 0 : index
    %c0_4 = arith.constant 0 : index
    %3 = vector.load %arg2[%c0_3, %c0_4] : memref<8x8xbf16, #tpu.memory_space<vmem>>, vector<8x8xbf16>
    %cst = arith.constant dense<0.000000e+00> : vector<8x256xf32>
    %4 = tpu.matmul %3, %1, %cst {dimension_numbers = #tpu.dot_dimension_numbers<[1], [0], [0], [1], [0, 0, 1, 1], [], []>} : vector<8x8xbf16>, vector<8x256xbf16>, vector<8x256xf32> -> vector<8x256xf32>
    %5 = arith.truncf %4 : vector<8x256xf32> to vector<8x256xbf16>
    %cst_5 = arith.constant dense<0.000000e+00> : vector<8x256xf32>
    %6 = tpu.matmul %5, %2, %cst_5 {dimension_numbers = #tpu.dot_dimension_numbers<[1], [0], [0], [1], [0, 0, 1, 1], [], []>} : vector<8x256xbf16>, vector<256x256xbf16>, vector<8x256xf32> -> vector<8x256xf32>
    %c0_6 = arith.constant 0 : index
    %c0_7 = arith.constant 0 : index
    %7 = vector.load %arg3[%c0_6, %c0_7] : memref<8x1xf32, #tpu.memory_space<vmem>>, vector<8x1xf32>
    %8 = vector.broadcast %7 : vector<8x1xf32> to vector<8x256xf32>
    %9 = arith.addf %6, %8 : vector<8x256xf32>
    %cst_8 = arith.constant 5.000000e-01 : f32
    %10 = vector.broadcast %cst_8 : f32 to vector<8x256xf32>
    %11 = arith.mulf %10, %9 : vector<8x256xf32>
    %cst_9 = arith.constant 0.707106769 : f32
    %12 = vector.broadcast %cst_9 : f32 to vector<8x256xf32>
    %13 = arith.mulf %9, %12 : vector<8x256xf32>
    %cst_10 = arith.constant 0.000000e+00 : f32
    %14 = vector.broadcast %cst_10 : f32 to vector<8x256xf32>
    %15 = arith.cmpf oge, %13, %14 : vector<8x256xf32>
    %cst_11 = arith.constant 1.000000e+00 : f32
    %cst_12 = arith.constant -1.000000e+00 : f32
    %16 = vector.broadcast %cst_11 : f32 to vector<8x256xf32>
    %17 = vector.broadcast %cst_12 : f32 to vector<8x256xf32>
    %18 = arith.select %15, %16, %17 : vector<8x256xi1>, vector<8x256xf32>
    %19 = math.absf %13 : vector<8x256xf32>
    %cst_13 = arith.constant 0.327591091 : f32
    %20 = vector.broadcast %cst_13 : f32 to vector<8x256xf32>
    %21 = arith.mulf %20, %19 : vector<8x256xf32>
    %cst_14 = arith.constant 1.000000e+00 : f32
    %22 = vector.broadcast %cst_14 : f32 to vector<8x256xf32>
    %23 = arith.addf %22, %21 : vector<8x256xf32>
    %cst_15 = arith.constant 1.000000e+00 : f32
    %24 = vector.broadcast %cst_15 : f32 to vector<8x256xf32>
    %25 = arith.divf %24, %23 : vector<8x256xf32>
    %cst_16 = arith.constant 1.06140542 : f32
    %26 = vector.broadcast %cst_16 : f32 to vector<8x256xf32>
    %27 = arith.mulf %25, %26 : vector<8x256xf32>
    %cst_17 = arith.constant -1.45315206 : f32
    %28 = vector.broadcast %cst_17 : f32 to vector<8x256xf32>
    %29 = arith.addf %28, %27 : vector<8x256xf32>
    %30 = arith.mulf %25, %29 : vector<8x256xf32>
    %cst_18 = arith.constant 1.42141378 : f32
    %31 = vector.broadcast %cst_18 : f32 to vector<8x256xf32>
    %32 = arith.addf %31, %30 : vector<8x256xf32>
    %33 = arith.mulf %25, %32 : vector<8x256xf32>
    %cst_19 = arith.constant -0.284496725 : f32
    %34 = vector.broadcast %cst_19 : f32 to vector<8x256xf32>
    %35 = arith.addf %34, %33 : vector<8x256xf32>
    %36 = arith.mulf %25, %35 : vector<8x256xf32>
    %cst_20 = arith.constant 0.254829586 : f32
    %37 = vector.broadcast %cst_20 : f32 to vector<8x256xf32>
    %38 = arith.addf %37, %36 : vector<8x256xf32>
    %39 = arith.mulf %25, %38 : vector<8x256xf32>
    %cst_21 = arith.constant 0.000000e+00 : f32
    %40 = vector.broadcast %cst_21 : f32 to vector<8x256xf32>
    %41 = arith.subf %40, %19 : vector<8x256xf32>
    %42 = arith.mulf %41, %19 : vector<8x256xf32>
    %43 = math.exp %42 : vector<8x256xf32>
    %44 = arith.mulf %39, %43 : vector<8x256xf32>
    %cst_22 = arith.constant 1.000000e+00 : f32
    %45 = vector.broadcast %cst_22 : f32 to vector<8x256xf32>
    %46 = arith.subf %45, %44 : vector<8x256xf32>
    %47 = arith.mulf %18, %46 : vector<8x256xf32>
    %cst_23 = arith.constant 1.000000e+00 : f32
    %48 = vector.broadcast %cst_23 : f32 to vector<8x256xf32>
    %49 = arith.addf %48, %47 : vector<8x256xf32>
    %50 = arith.mulf %11, %49 : vector<8x256xf32>
    %c0_24 = arith.constant 0 : index
    %c0_25 = arith.constant 0 : index
    %51 = vector.load %arg4[%c0_24, %c0_25] : memref<8x8xbf16, #tpu.memory_space<vmem>>, vector<8x8xbf16>
    %52 = arith.truncf %50 : vector<8x256xf32> to vector<8x256xbf16>
    %cst_26 = arith.constant dense<0.000000e+00> : vector<8x256xf32>
    %53 = tpu.matmul %51, %52, %cst_26 {dimension_numbers = #tpu.dot_dimension_numbers<[1], [0], [0], [1], [0, 0, 1, 1], [], []>} : vector<8x8xbf16>, vector<8x256xbf16>, vector<8x256xf32> -> vector<8x256xf32>
    %54 = arith.truncf %53 : vector<8x256xf32> to vector<8x256xbf16>
    %cst_27 = arith.constant dense<0.000000e+00> : vector<8x256xf32>
    %55 = tpu.matmul %54, %2, %cst_27 {dimension_numbers = #tpu.dot_dimension_numbers<[1], [0], [0], [1], [0, 0, 1, 1], [], []>} : vector<8x256xbf16>, vector<256x256xbf16>, vector<8x256xf32> -> vector<8x256xf32>
    %c0_28 = arith.constant 0 : index
    %c0_29 = arith.constant 0 : index
    %56 = vector.load %arg5[%c0_28, %c0_29] : memref<8x1xf32, #tpu.memory_space<vmem>>, vector<8x1xf32>
    %57 = vector.broadcast %56 : vector<8x1xf32> to vector<8x256xf32>
    %58 = arith.addf %55, %57 : vector<8x256xf32>
    %c0_30 = arith.constant 0 : index
    %c0_31 = arith.constant 0 : index
    %59 = vector.load %arg6[%c0_30, %c0_31] : memref<8x256xf32, #tpu.memory_space<vmem>>, vector<8x256xf32>
    tpu.vector_store %arg6[%c0_30, %c0_31], %58 {strides = array<i32>} : memref<8x256xf32, #tpu.memory_space<vmem>>, vector<8x256xf32>,
    return
  }
}

</mosaic_0001>

<bundles_post_ra>
// kernel: graph_conv_block.1
= control target key start
LH: loop header
LB: loop body
LE: loop exit
PB: predicated region body
PF: predicated region fallthrough
CT: control target
= control target key end

     0   :  { %11 = vsyncpa [#allocation3], 0  ;;  %s619_s21 = smov [#allocation2]   ;;  %s820_s0 = inlined_call_operand.vmem [shape: f32[8,256], index: 0, kind: input, shape index: {}]   ;;  %s821_s1 = inlined_call_operand.hbm [shape: bf16[256,256], index: 1, kind: input, shape index: {}]   ;;  %s822_s2 = inlined_call_operand.vmem [shape: bf16[8,8], index: 2, kind: input, shape index: {}]   ;;  %s823_s3 = inlined_call_operand.vmem [shape: f32[8,1], index: 3, kind: input, shape index: {}]   ;;  %s824_s4 = inlined_call_operand.vmem [shape: bf16[8,8], index: 4, kind: input, shape index: {}]   ;;  %s825_s5 = inlined_call_operand.vmem [shape: f32[8,1], index: 5, kind: input, shape index: {}]   ;;  %s826_s6 = inlined_call_operand.vmem [shape: f32[8,256], index: 6, kind: output, shape index: {}]  }
   0x1   :  { %s19_s22 = sshll.u32 %s619_s21, 4  ;;  %s20_s22 = int_to_ptr.vmem [resolvable:$true] %s19_s22 }
   0x2   :  { %s605_s23 = scalar_lea.vmem %s20_s22, 4096  ;;  %p610_p1 = scmp.lt.s32.totalorder %s20_s22, %s20_s22 }
   0x3   :  { %p606_p0 = scmp.ne.s32.totalorder %s20_s22, %s605_s23  ;;  %p611_p2 = scmp.lt.s32.totalorder %s605_s23, %s605_s23 }
   0x5   :  { %p612_p3 = por %p611_p2, %p610_p1 }
   0x7   :  { %p613_p4 = pnand %p612_p3, %p606_p0 }
   0x9   :  { %616 = shalt.err (!%p613_p4)
}
   0xa   :  { %s620_s24 = smov 128   ;;  %s621_s25 = smov 8  }
   0xb   :  { %25 = dma.hbm_to_vmem [thread:$0]  %s821_s1, 4096, %s20_s22, [#allocation3], %s620_s24, %s620_s24, %s621_s25  }
   0xc   :  { %617 = dma.done.wait [#allocation3], 4096  }
   0xd   :  { %618 = vsyncadd [#allocation3], 4294963200  ;;  %v622_v0 = vmov 0   ;;  %v39_v1 = vld [vmem:[%s820_s0 + $0x8] sm:$0xff]  ;;  %vm79_vm0 = vcmask 1043456   ;;  %v38_v2 = vld [vmem:[%s820_s0] sm:$0xff] }
   0xe   :  { %118 = vmatprep.mubr.bf16.mxu1 %v622_v0  ;;  %540 = vset.pattern.permute.xlu0 %v622_v0  ;;  %v41_v3 = vpack.c.bf16 %v39_v1, %v39_v1  ;;  %v40_v4 = vpack.c.bf16 %v38_v2, %v38_v2  ;;  %v668_v5 = vld [vmem:[#allocation2 + $0x74] ss:$8 sps:$4 sm:$0xff]   ;;  %v74_v7 = vld [vmem:[%s822_s2] sm:$0xf]  ;;  %vm75_vm1 = vcmask 64512  }
   0xf   :  { %434 = vmatprep.mubr.bf16.mxu0 %v622_v0  ;;  %v675_v8 = vld [vmem:[#allocation2 + $0x70] ss:$8 sps:$4 sm:$0xff]   ;;  %v678_v9 = vld [vmem:[#allocation2 + $0x64] ss:$8 sps:$4 sm:$0xff]   ;;  %v682_v10 = vld [vmem:[#allocation2 + $0x60] ss:$8 sps:$4 sm:$0xff]  }
  0x10   :  { %499 = vmatprep.subr.msk.bf16.mxu1 %vm79_vm0, %v41_v3  ;;  %v81_v6 = vsel %vm79_vm0, %v40_v4, 0  ;;  %v685_v11 = vld [vmem:[#allocation2 + $0x54] ss:$8 sps:$4 sm:$0xff]   ;;  %v688_v12 = vld [vmem:[#allocation2 + $0x50] ss:$8 sps:$4 sm:$0xff]   ;;  %v129_v39 = vld [vmem:[%s823_s3] sm:$0xff] }
  0x11   :  { %101 = vmatpush1.bf16.msra.mxu1 %v81_v6  ;;  %v691_v13 = vld [vmem:[#allocation2 + $0x44] ss:$8 sps:$4 sm:$0xff]   ;;  %v694_v14 = vld [vmem:[#allocation2 + $0x40] ss:$8 sps:$4 sm:$0xff]   ;;  %v697_v15 = vld [vmem:[#allocation2 + $0x34] ss:$8 sps:$4 sm:$0xff]   ;;  %132 = vperm.xlu0 %540, %v129_v39  }
  0x12   :  { %295 = vmatprep.subr.bf16.mxu1 %v668_v5  ;;  %v700_v16 = vld [vmem:[#allocation2 + $0x30] ss:$8 sps:$4 sm:$0xff]   ;;  %v703_v17 = vld [vmem:[#allocation2 + $0x24] ss:$8 sps:$4 sm:$0xff]   ;;  %v706_v18 = vld [vmem:[#allocation2 + $0x20] ss:$8 sps:$4 sm:$0xff]  }
  0x13   :  { %v709_v19 = vld [vmem:[#allocation2 + $0x14] ss:$8 sps:$4 sm:$0xff]   ;;  %v712_v20 = vld [vmem:[#allocation2 + $0x10] ss:$8 sps:$4 sm:$0xff]   ;;  %v715_v21 = vld [vmem:[#allocation2 + $0x4] ss:$8 sps:$4 sm:$0xff]  }
  0x14   :  { %500 = vmatmul.mubr.msk.bf16.vlgmr.msra.gmra.mxu1 %vm75_vm1, %v74_v7  ;;  %v718_v22 = vld [vmem:[#allocation2] ss:$8 sps:$4 sm:$0xff]   ;;  %v721_v23 = vld [vmem:[#allocation2 + $0xf4] ss:$8 sps:$4 sm:$0xff]   ;;  %v724_v24 = vld [vmem:[#allocation2 + $0xf0] ss:$8 sps:$4 sm:$0xff]  }
  0x15   :  { %296 = vmatpush1.bf16.msra.mxu1 %v675_v8  ;;  %v727_v25 = vld [vmem:[#allocation2 + $0xe4] ss:$8 sps:$4 sm:$0xff]   ;;  %v730_v26 = vld [vmem:[#allocation2 + $0xe0] ss:$8 sps:$4 sm:$0xff]   ;;  %v733_v27 = vld [vmem:[#allocation2 + $0xd4] ss:$8 sps:$4 sm:$0xff]  }
  0x16   :  { %297 = vmatprep.subr.bf16.mxu1 %v678_v9  ;;  %v736_v28 = vld [vmem:[#allocation2 + $0xd0] ss:$8 sps:$4 sm:$0xff]   ;;  %v739_v29 = vld [vmem:[#allocation2 + $0xc4] ss:$8 sps:$4 sm:$0xff]   ;;  %v742_v30 = vld [vmem:[#allocation2 + $0xc0] ss:$8 sps:$4 sm:$0xff]  }
  0x17   :  { %v745_v31 = vld [vmem:[#allocation2 + $0xb4] ss:$8 sps:$4 sm:$0xff]   ;;  %v748_v32 = vld [vmem:[#allocation2 + $0xb0] ss:$8 sps:$4 sm:$0xff]   ;;  %v751_v33 = vld [vmem:[#allocation2 + $0xa4] ss:$8 sps:$4 sm:$0xff]  }
  0x18   :  { %v754_v34 = vld [vmem:[#allocation2 + $0xa0] ss:$8 sps:$4 sm:$0xff]   ;;  %v757_v35 = vld [vmem:[#allocation2 + $0x94] ss:$8 sps:$4 sm:$0xff]   ;;  %v760_v36 = vld [vmem:[#allocation2 + $0x90] ss:$8 sps:$4 sm:$0xff]  }
  0x19   :  { %298 = vmatpush1.bf16.msra.mxu1 %v682_v10  ;;  %v764_v37 = vld [vmem:[#allocation2 + $0x84] ss:$8 sps:$4 sm:$0xff]   ;;  %v766_v38 = vld [vmem:[#allocation2 + $0x80] ss:$8 sps:$4 sm:$0xff]  }
  0x1a   :  { %299 = vmatprep.subr.bf16.mxu1 %v685_v11  ;;  %v445_v40 = vld [vmem:[%s825_s5] sm:$0xff] }
  0x1b   :  { %448 = vperm.xlu0 %540, %v445_v40  }
  0x1d   :  { %300 = vmatpush1.bf16.msra.mxu1 %v688_v12 }
  0x1e   :  { %301 = vmatprep.subr.bf16.mxu1 %v691_v13 }
  0x21   :  { %302 = vmatpush1.bf16.msra.mxu1 %v694_v14 }
  0x22   :  { %303 = vmatprep.subr.bf16.mxu1 %v697_v15 }
  0x25   :  { %304 = vmatpush1.bf16.msra.mxu1 %v700_v16 }
  0x26   :  { %305 = vmatprep.subr.bf16.mxu1 %v703_v17 }
  0x29   :  { %306 = vmatpush1.bf16.msra.mxu1 %v706_v18 }
  0x2a   :  { %307 = vmatprep.subr.bf16.mxu1 %v709_v19 }
  0x2d   :  { %308 = vmatpush1.bf16.msra.mxu1 %v712_v20 }
  0x2e   :  { %309 = vmatprep.subr.bf16.mxu1 %v715_v21 }
  0x31   :  { %310 = vmatpush1.bf16.msra.mxu1 %v718_v22 }
  0x32   :  { %311 = vmatprep.subr.bf16.mxu1 %v721_v23 }
  0x35   :  { %312 = vmatpush2.bf16.msra.mxu1 %v724_v24 }
  0x36   :  { %313 = vmatprep.subr.bf16.mxu1 %v727_v25 }
  0x39   :  { %314 = vmatpush2.bf16.msra.mxu1 %v730_v26 }
  0x3a   :  { %315 = vmatprep.subr.bf16.mxu1 %v733_v27 }
  0x3d   :  { %316 = vmatpush2.bf16.msra.mxu1 %v736_v28 }
  0x3e   :  { %317 = vmatprep.subr.bf16.mxu1 %v739_v29 }
  0x41   :  { %318 = vmatpush2.bf16.msra.mxu1 %v742_v30 }
  0x42   :  { %319 = vmatprep.subr.bf16.mxu1 %v745_v31 }
  0x45   :  { %320 = vmatpush2.bf16.msra.mxu1 %v748_v32 }
  0x46   :  { %321 = vmatprep.subr.bf16.mxu1 %v751_v33 }
  0x49   :  { %322 = vmatpush2.bf16.msra.mxu1 %v754_v34 }
  0x4a   :  { %323 = vmatprep.subr.bf16.mxu1 %v757_v35 }
  0x4d   :  { %324 = vmatpush2.bf16.msra.mxu1 %v760_v36 }
  0x4e   :  { %325 = vmatprep.subr.bf16.mxu1 %v764_v37 }
  0x51   :  { %326 = vmatpush2.bf16.msra.mxu1 %v766_v38 }
  0x8c   :  { %v133_v47 = vpop.permute.xlu0 %132 }
  0xd4   :  { %v120_v41 = vpop.f32.mrf.mxu1 }
  0xd5   :  { %v127_v44 = vpack.c.bf16 %v120_v41, %v120_v41 }
  0xd6   :  { %v122_v42 = vpop.f32.mrf.mxu1 }
  0xd7   :  { %v128_v43 = vpack.c.bf16 %v122_v42, %v122_v42 }
  0xd8   :  { %v124_v45 = vpop.f32.mrf.mxu1 }
  0xd9   :  { %327 = vmatprep.mubr.bf16.mxu1 %v128_v43 }
  0xda   :  { %v125_v46 = vpop.f32.mrf.mxu1  ;;  %328 = vmatmul.mubr.bf16.vlgmr.msra.gmra.mxu1 %v127_v44 }
 0x19a   :  { %v329_v48 = vpop.f32.mrf.mxu1 }
 0x19b   :  { %v330_v49 = vadd.f32 %v329_v48, %v133_v47 }
 0x19c   :  { %v331_v50 = vpop.f32.mrf.mxu1 }
 0x19d   :  { %v338_v51 = vmul.f32 0.70710677, %v330_v49  ;;  %v332_v52 = vadd.f32 %v331_v50, %v133_v47 }
 0x19e   :  { %v333_v53 = vpop.f32.mrf.mxu1 }
 0x19f   :  { %v344_v54 = vand.u32 2147483647, %v338_v51  ;;  %v339_v55 = vmul.f32 0.70710677, %v332_v52  ;;  %vm340_vm2 = vcmp.ge.f32.partialorder %v338_v51, 0.0 }
 0x1a0   :  { %v334_v56 = vpop.f32.mrf.mxu1 }
 0x1a1   :  { %v346_v57 = vmul.f32 0.3275911, %v344_v54  ;;  %v345_v58 = vand.u32 2147483647, %v339_v55  ;;  %v372_v62 = vsub.f32 0.0, %v344_v54  ;;  %vm341_vm3 = vcmp.ge.f32.partialorder %v339_v55, 0.0 }
 0x1a2   :  { %v390_v55 = vld [vmem:[%s824_s4] sm:$0xf] }
 0x1a3   :  { %v348_v59 = vadd.f32 1.0, %v346_v57  ;;  %v347_v60 = vmul.f32 0.3275911, %v345_v58  ;;  %v373_v63 = vsub.f32 0.0, %v345_v58  ;;  %v374_v0 = vmul.f32 %v372_v62, %v344_v54 }
 0x1a5   :  { %589 = vrcp.f32 %v348_v59  ;;  %v349_v61 = vadd.f32 1.0, %v347_v60  ;;  %v375_v2 = vmul.f32 %v373_v63, %v345_v58  ;;  %v376_v3 = vmul.f32 1.442695, %v374_v0 }
 0x1a6   :  { %v623_v0 = vmov -1.0  }
 0x1a7   :  { %591 = vrcp.f32 %v349_v61  ;;  %v378_v39 = vmul.f32 1.442695, %v375_v2  ;;  %v342_v2 = vsel %vm340_vm2, 1.0, %v623_v0 }
 0x1a8   :  { %593 = vpow2.f32 %v376_v3 }
 0x1a9   :  { %595 = vpow2.f32 %v378_v39  ;;  %v336_v39 = vmul.f32 0.5, %v330_v49 }
 0x1b2   :  { %v590_v1 = vpop.eup %589 }
 0x1b3   :  { %v354_v4 = vmul.f32 1.0614054, %v590_v1 }
 0x1b4   :  { %v592_v6 = vpop.eup %591 }
 0x1b5   :  { %v356_v7 = vadd.f32 -1.4531521, %v354_v4  ;;  %v355_v40 = vmul.f32 1.0614054, %v592_v6  ;;  %v594_v58 = vpop.eup %593 }
 0x1b6   :  { %v596_v62 = vpop.eup %595 }
 0x1b7   :  { %v358_v41 = vmul.f32 %v590_v1, %v356_v7  ;;  %v357_v42 = vadd.f32 -1.4531521, %v355_v40  ;;  %v343_v40 = vsel %vm341_vm3, 1.0, %v623_v0 }
 0x1b9   :  { %v360_v43 = vadd.f32 1.4214138, %v358_v41  ;;  %v359_v44 = vmul.f32 %v592_v6, %v357_v42 }
 0x1bb   :  { %v362_v45 = vmul.f32 %v590_v1, %v360_v43  ;;  %v361_v46 = vadd.f32 1.4214138, %v359_v44  ;;  %v337_v44 = vmul.f32 0.5, %v332_v52 }
 0x1bd   :  { %v364_v47 = vadd.f32 -0.28449672, %v362_v45  ;;  %v363_v48 = vmul.f32 %v592_v6, %v361_v46 }
 0x1bf   :  { %v366_v50 = vmul.f32 %v590_v1, %v364_v47  ;;  %v365_v53 = vadd.f32 -0.28449672, %v363_v48 }
 0x1c1   :  { %v368_v54 = vadd.f32 0.2548296, %v366_v50  ;;  %v367_v56 = vmul.f32 %v592_v6, %v365_v53 }
 0x1c3   :  { %v370_v57 = vmul.f32 %v590_v1, %v368_v54  ;;  %v369_v59 = vadd.f32 0.2548296, %v367_v56 }
 0x1c5   :  { %v380_v60 = vmul.f32 %v594_v58, %v370_v57  ;;  %v371_v61 = vmul.f32 %v592_v6, %v369_v59 }
 0x1c7   :  { %v382_v63 = vsub.f32 1.0, %v380_v60  ;;  %v381_v3 = vmul.f32 %v596_v62, %v371_v61 }
 0x1c9   :  { %v384_v4 = vmul.f32 %v382_v63, %v342_v2  ;;  %v383_v7 = vsub.f32 1.0, %v381_v3 }
 0x1cb   :  { %v386_v41 = vadd.f32 1.0, %v384_v4  ;;  %v385_v42 = vmul.f32 %v383_v7, %v343_v40 }
 0x1cd   :  { %v388_v43 = vmul.f32 %v386_v41, %v336_v39  ;;  %v387_v1 = vadd.f32 1.0, %v385_v42 }
 0x1cf   :  { %v389_v45 = vmul.f32 %v387_v1, %v337_v44  ;;  %v391_v46 = vpack.c.bf16 %v388_v43, %v388_v43 }
 0x1d1   :  { %v392_v51 = vpack.c.bf16 %v389_v45, %v389_v45  ;;  %v397_v6 = vsel %vm79_vm0, %v391_v46, 0 }
 0x1d3   :  { %533 = vmatprep.subr.msk.bf16.mxu0 %vm79_vm0, %v392_v51 }
 0x1d4   :  { %417 = vmatpush1.bf16.msra.mxu0 %v397_v6 }
 0x1d5   :  { %451 = vmatprep.subr.bf16.mxu0 %v668_v5 }
 0x1d7   :  { %534 = vmatmul.mubr.msk.bf16.vlgmr.msra.gmra.mxu0 %vm75_vm1, %v390_v55 }
 0x1d8   :  { %452 = vmatpush1.bf16.msra.mxu0 %v675_v8 }
 0x1d9   :  { %453 = vmatprep.subr.bf16.mxu0 %v678_v9 }
 0x1dc   :  { %454 = vmatpush1.bf16.msra.mxu0 %v682_v10 }
 0x1dd   :  { %455 = vmatprep.subr.bf16.mxu0 %v685_v11 }
 0x1e0   :  { %456 = vmatpush1.bf16.msra.mxu0 %v688_v12 }
 0x1e1   :  { %457 = vmatprep.subr.bf16.mxu0 %v691_v13  ;;  %v449_v13 = vpop.permute.xlu0 %448 }
 0x1e4   :  { %458 = vmatpush1.bf16.msra.mxu0 %v694_v14 }
 0x1e5   :  { %459 = vmatprep.subr.bf16.mxu0 %v697_v15 }
 0x1e8   :  { %460 = vmatpush1.bf16.msra.mxu0 %v700_v16 }
 0x1e9   :  { %461 = vmatprep.subr.bf16.mxu0 %v703_v17 }
 0x1ec   :  { %462 = vmatpush1.bf16.msra.mxu0 %v706_v18 }
 0x1ed   :  { %463 = vmatprep.subr.bf16.mxu0 %v709_v19 }
 0x1f0   :  { %464 = vmatpush1.bf16.msra.mxu0 %v712_v20 }
 0x1f1   :  { %465 = vmatprep.subr.bf16.mxu0 %v715_v21 }
 0x1f4   :  { %466 = vmatpush1.bf16.msra.mxu0 %v718_v22 }
 0x1f5   :  { %467 = vmatprep.subr.bf16.mxu0 %v721_v23 }
 0x1f8   :  { %468 = vmatpush2.bf16.msra.mxu0 %v724_v24 }
 0x1f9   :  { %469 = vmatprep.subr.bf16.mxu0 %v727_v25 }
 0x1fc   :  { %470 = vmatpush2.bf16.msra.mxu0 %v730_v26 }
 0x1fd   :  { %471 = vmatprep.subr.bf16.mxu0 %v733_v27 }
 0x200   :  { %472 = vmatpush2.bf16.msra.mxu0 %v736_v28 }
 0x201   :  { %473 = vmatprep.subr.bf16.mxu0 %v739_v29 }
 0x204   :  { %474 = vmatpush2.bf16.msra.mxu0 %v742_v30 }
 0x205   :  { %475 = vmatprep.subr.bf16.mxu0 %v745_v31 }
 0x208   :  { %476 = vmatpush2.bf16.msra.mxu0 %v748_v32 }
 0x209   :  { %477 = vmatprep.subr.bf16.mxu0 %v751_v33 }
 0x20c   :  { %478 = vmatpush2.bf16.msra.mxu0 %v754_v34 }
 0x20d   :  { %479 = vmatprep.subr.bf16.mxu0 %v757_v35 }
 0x210   :  { %480 = vmatpush2.bf16.msra.mxu0 %v760_v36 }
 0x211   :  { %481 = vmatprep.subr.bf16.mxu0 %v764_v37 }
 0x214   :  { %482 = vmatpush2.bf16.msra.mxu0 %v766_v38 }
 0x297   :  { %v436_v5 = vpop.f32.mrf.mxu0 }
 0x298   :  { %v443_v10 = vpack.c.bf16 %v436_v5, %v436_v5 }
 0x299   :  { %v438_v8 = vpop.f32.mrf.mxu0 }
 0x29a   :  { %v444_v9 = vpack.c.bf16 %v438_v8, %v438_v8 }
 0x29b   :  { %v440_v11 = vpop.f32.mrf.mxu0 }
 0x29c   :  { %483 = vmatprep.mubr.bf16.mxu0 %v444_v9 }
 0x29d   :  { %v441_v12 = vpop.f32.mrf.mxu0  ;;  %484 = vmatmul.mubr.bf16.vlgmr.msra.gmra.mxu0 %v443_v10 }
 0x35d   :  { %v485_v14 = vpop.f32.mrf.mxu0 }
 0x35e   :  { %v486_v15 = vadd.f32 %v485_v14, %v449_v13 }
 0x35f   :  { %v487_v16 = vpop.f32.mrf.mxu0 }
 0x360   :  { %492 = vst [vmem:[%s826_s6] sm:$0xff] %v486_v15  ;;  %v488_v17 = vadd.f32 %v487_v16, %v449_v13 }
 0x361   :  { %v489_v18 = vpop.f32.mrf.mxu0 }
 0x362   :  { %493 = vst [vmem:[%s826_s6 + $0x8] sm:$0xff] %v488_v17 }
 0x363   :  { %v490_v19 = vpop.f32.mrf.mxu0 }
 0x364   :  { %498 = vsyncpa [#allocation3], 1 }

</bundles_post_ra>
